<compile_context>
chip_gen: v6e
topology: v6e:2x2x1
jax: 0.10.0
libtpu: 0.0.40
codegen_flags: <defaults>
</compile_context>

<pallas_src>
import functools

import jax
import jax.numpy as jnp
from jax.experimental import pallas as pl
from jax.experimental.pallas import tpu as pltpu

_EPS = 1e-5


def _projection_kernel(*refs, n_layers: int, eps: float, matmul_dtype):
    """Fused [Linear -> BN(train) -> ReLU]*(L-1) -> Linear -> BN(train).

    refs = (x_ref, w0_ref, gb0_ref, w1_ref, gb1_ref, ..., o_ref)
      x_ref  : (N, in_dim)      f32
      wi_ref : (d_in, d_out)    matmul_dtype   (PyTorch weight, transposed)
      gbi_ref: (2, d_out)       f32            row 0 = gamma, row 1 = beta
      o_ref  : (N, out_dim)     f32
    The full batch lives in one VMEM block because BN reduces over the batch.
    """
    x_ref = refs[0]
    o_ref = refs[-1]
    layer_refs = refs[1:-1]

    h = x_ref[...].astype(jnp.float32)
    inv_n = 1.0 / h.shape[0]

    for i in range(n_layers):
        w_ref = layer_refs[2 * i]
        gb_ref = layer_refs[2 * i + 1]

        # Linear (bias omitted: cancelled by the BN mean subtraction).
        y = jnp.dot(h.astype(matmul_dtype), w_ref[...],
                    preferred_element_type=jnp.float32)

        # One-pass batch statistics: E[y], E[y^2] (two back-to-back reductions).
        s1 = jnp.sum(y, axis=0, keepdims=True)
        s2 = jnp.sum(y * y, axis=0, keepdims=True)
        mean = s1 * inv_n
        var = jnp.maximum(s2 * inv_n - mean * mean, 0.0)  # biased variance

        # Fold BN into a single scale/shift: out = y * scale + shift.
        gamma = gb_ref[0:1, :]
        beta = gb_ref[1:2, :]
        scale = gamma * jax.lax.rsqrt(var + eps)          # EUP rsqrt
        shift = beta - mean * scale
        h = y * scale + shift

        if i < n_layers - 1:
            h = jnp.maximum(h, 0.0)                        # ReLU

    o_ref[...] = h.astype(o_ref.dtype)


def projection_forward(x, params, *, matmul_dtype=jnp.float32, eps=_EPS):
    """Whole Projection module as a single fused Pallas call."""
    n_layers = len(params)
    n = x.shape[0]
    out_dim = params[-1][0].shape[1]

    inputs = [x]
    for (w, _b, gamma, beta) in params:     # bias intentionally not shipped
        w_in = w if matmul_dtype == jnp.float32 else w.astype(matmul_dtype)
        gb = jnp.concatenate([gamma, beta], axis=0)        # (2, d_out)
        inputs.extend([w_in, gb])

    # Explicit VMEM budget: inputs + output + a few f32 activation copies.
    max_width = max(max(w.shape) for (w, _b, _g, _bt) in params)
    in_bytes = sum(int(a.size) * a.dtype.itemsize for a in inputs)
    act_bytes = 4 * n * max_width * 4       # a few live f32 intermediates
    out_bytes = n * out_dim * 4
    vmem_limit = int(min(64 * 2**20,
                         max(16 * 2**20, 2 * (in_bytes + act_bytes + out_bytes))))

    kernel = functools.partial(_projection_kernel, n_layers=n_layers,
                               eps=eps, matmul_dtype=matmul_dtype)
    return pl.pallas_call(
        kernel,
        out_shape=jax.ShapeDtypeStruct((n, out_dim), jnp.float32),
        # Gridless: every array is a single full-extent VMEM-resident block.
        in_specs=[pl.BlockSpec(memory_space=pltpu.MemorySpace.VMEM)] * len(inputs),
        out_specs=pl.BlockSpec(memory_space=pltpu.MemorySpace.VMEM),
        compiler_params=pltpu.CompilerParams(vmem_limit_bytes=vmem_limit),
    )(*inputs)


def init_projection_params(key, in_dim, out_dim, hsz, n_layers):
    """Deterministic synthetic params mirroring the PyTorch module's shapes."""
    params = []
    prev_dim = in_dim
    for i in range(n_layers):
        d_out = out_dim if i == n_layers - 1 else hsz
        key, kw, kb = jax.random.split(key, 3)
        bound = 1.0 / jnp.sqrt(prev_dim)        # nn.Linear default-ish init
        w = jax.random.uniform(kw, (prev_dim, d_out), jnp.float32, -bound, bound)
        b = jax.random.uniform(kb, (1, d_out), jnp.float32, -bound, bound)
        gamma = jnp.ones((1, d_out), jnp.float32)    # BatchNorm1d weight init
        beta = jnp.zeros((1, d_out), jnp.float32)    # BatchNorm1d bias init
        params.append((w, b, gamma, beta))
        prev_dim = d_out
    return params


def projection_forward_ref(x, params, *, matmul_dtype=jnp.float32, eps=_EPS):
    """Pure-JAX reference (faithful to PyTorch: includes the Linear bias)."""
    h = x
    n_layers = len(params)
    for i, (w, b, gamma, beta) in enumerate(params):
        y = jnp.dot(h.astype(matmul_dtype), w.astype(matmul_dtype),
                    preferred_element_type=jnp.float32) + b
        mean = jnp.mean(y, axis=0, keepdims=True)
        var = jnp.mean((y - mean) ** 2, axis=0, keepdims=True)
        y = (y - mean) / jnp.sqrt(var + eps) * gamma + beta
        if i < n_layers - 1:
            y = jnp.maximum(y, 0.0)
        h = y
    return h


if __name__ == "__main__":
    # Small but lane-aligned shapes (feature dims % 128 == 0, batch % 8 == 0),
    # consistent with Projection(in_dim, out_dim, hsz, n_layers=3).
    batch, in_dim, hsz, out_dim, n_layers = 16, 128, 256, 128, 3

    key = jax.random.PRNGKey(0)
    key_x, key_p = jax.random.split(key)
    x = jax.random.normal(key_x, (batch, in_dim), jnp.float32)
    params = init_projection_params(key_p, in_dim, out_dim, hsz, n_layers)

    # f32 matmul path: strict check vs. the bias-including PyTorch-style ref
    # (also demonstrates the bias is a BN-cancelled no-op).
    out = projection_forward(x, params)
    jax.block_until_ready(out)
    ref = projection_forward_ref(x, params)
    assert out.shape == (batch, out_dim)
    assert jnp.allclose(out, ref, atol=2e-4, rtol=2e-4), "f32 mismatch vs reference"

    # bf16-matmul path (f32 accumulation + f32 BN math): compare against a
    # reference using the same mixed precision.
    out_bf16 = projection_forward(x, params, matmul_dtype=jnp.bfloat16)
    jax.block_until_ready(out_bf16)
    ref_bf16 = projection_forward_ref(x, params, matmul_dtype=jnp.bfloat16)
    assert jnp.allclose(out_bf16, ref_bf16, atol=5e-2, rtol=5e-2), \
        "bf16 mismatch vs mixed-precision reference"

    print("KERNEL_OK")
</pallas_src>

<mosaic_0001>
module attributes {stable_mosaic.version = 11 : i64} {
  func.func @_projection_kernel(%arg0: memref<16x128xf32, #tpu.memory_space<vmem>>, %arg1: memref<128x256xf32, #tpu.memory_space<vmem>>, %arg2: memref<2x256xf32, #tpu.memory_space<vmem>>, %arg3: memref<256x256xf32, #tpu.memory_space<vmem>>, %arg4: memref<2x256xf32, #tpu.memory_space<vmem>>, %arg5: memref<256x128xf32, #tpu.memory_space<vmem>>, %arg6: memref<2x128xf32, #tpu.memory_space<vmem>>, %arg7: memref<16x128xf32, #tpu.memory_space<vmem>>) attributes {dimension_semantics = [], scalar_prefetch = 0 : i64, scratch_operands = 0 : i64, tpu.core_type = #tpu.core_type<tc>} {
    %c0 = arith.constant 0 : index
    %c0_0 = arith.constant 0 : index
    %0 = vector.load %arg0[%c0, %c0_0] : memref<16x128xf32, #tpu.memory_space<vmem>>, vector<16x128xf32>
    %c0_1 = arith.constant 0 : index
    %c0_2 = arith.constant 0 : index
    %1 = vector.load %arg1[%c0_1, %c0_2] : memref<128x256xf32, #tpu.memory_space<vmem>>, vector<128x256xf32>
    %cst = arith.constant dense<0.000000e+00> : vector<16x256xf32>
    %2 = tpu.matmul %0, %1, %cst {dimension_numbers = #tpu.dot_dimension_numbers<[1], [0], [0], [1], [0, 0, 1, 1], [], []>} : vector<16x128xf32>, vector<128x256xf32>, vector<16x256xf32> -> vector<16x256xf32>
    %cst_3 = arith.constant dense<0.000000e+00> : vector<256xf32>
    %3 = vector.multi_reduction <add>, %2, %cst_3 [0] : vector<16x256xf32> to vector<256xf32>
    %4 = vector.shape_cast %3 : vector<256xf32> to vector<1x256xf32>
    %5 = arith.mulf %2, %2 : vector<16x256xf32>
    %cst_4 = arith.constant dense<0.000000e+00> : vector<256xf32>
    %6 = vector.multi_reduction <add>, %5, %cst_4 [0] : vector<16x256xf32> to vector<256xf32>
    %7 = vector.shape_cast %6 : vector<256xf32> to vector<1x256xf32>
    %cst_5 = arith.constant 6.250000e-02 : f32
    %8 = vector.broadcast %cst_5 : f32 to vector<1x256xf32>
    %9 = arith.mulf %4, %8 : vector<1x256xf32>
    %cst_6 = arith.constant 6.250000e-02 : f32
    %10 = vector.broadcast %cst_6 : f32 to vector<1x256xf32>
    %11 = arith.mulf %7, %10 : vector<1x256xf32>
    %12 = arith.mulf %9, %9 : vector<1x256xf32>
    %13 = arith.subf %11, %12 : vector<1x256xf32>
    %cst_7 = arith.constant 0.000000e+00 : f32
    %14 = vector.broadcast %cst_7 : f32 to vector<1x256xf32>
    %15 = arith.maximumf %13, %14 : vector<1x256xf32>
    %c0_8 = arith.constant 0 : index
    %c0_9 = arith.constant 0 : index
    %16 = vector.load %arg2[%c0_8, %c0_9] : memref<2x256xf32, #tpu.memory_space<vmem>>, vector<1x256xf32>
    %c1 = arith.constant 1 : index
    %c0_10 = arith.constant 0 : index
    %17 = vector.load %arg2[%c1, %c0_10] : memref<2x256xf32, #tpu.memory_space<vmem>>, vector<1x256xf32>
    %cst_11 = arith.constant 9.99999974E-6 : f32
    %18 = vector.broadcast %cst_11 : f32 to vector<1x256xf32>
    %19 = arith.addf %15, %18 : vector<1x256xf32>
    %20 = math.rsqrt %19 : vector<1x256xf32>
    %21 = arith.mulf %16, %20 : vector<1x256xf32>
    %22 = arith.mulf %9, %21 : vector<1x256xf32>
    %23 = arith.subf %17, %22 : vector<1x256xf32>
    %24 = vector.broadcast %21 : vector<1x256xf32> to vector<16x256xf32>
    %25 = arith.mulf %2, %24 : vector<16x256xf32>
    %26 = vector.broadcast %23 : vector<1x256xf32> to vector<16x256xf32>
    %27 = arith.addf %25, %26 : vector<16x256xf32>
    %cst_12 = arith.constant 0.000000e+00 : f32
    %28 = vector.broadcast %cst_12 : f32 to vector<16x256xf32>
    %29 = arith.maximumf %27, %28 : vector<16x256xf32>
    %c0_13 = arith.constant 0 : index
    %c0_14 = arith.constant 0 : index
    %30 = vector.load %arg3[%c0_13, %c0_14] : memref<256x256xf32, #tpu.memory_space<vmem>>, vector<256x256xf32>
    %cst_15 = arith.constant dense<0.000000e+00> : vector<16x256xf32>
    %31 = tpu.matmul %29, %30, %cst_15 {dimension_numbers = #tpu.dot_dimension_numbers<[1], [0], [0], [1], [0, 0, 1, 1], [], []>} : vector<16x256xf32>, vector<256x256xf32>, vector<16x256xf32> -> vector<16x256xf32>
    %cst_16 = arith.constant dense<0.000000e+00> : vector<256xf32>
    %32 = vector.multi_reduction <add>, %31, %cst_16 [0] : vector<16x256xf32> to vector<256xf32>
    %33 = vector.shape_cast %32 : vector<256xf32> to vector<1x256xf32>
    %34 = arith.mulf %31, %31 : vector<16x256xf32>
    %cst_17 = arith.constant dense<0.000000e+00> : vector<256xf32>
    %35 = vector.multi_reduction <add>, %34, %cst_17 [0] : vector<16x256xf32> to vector<256xf32>
    %36 = vector.shape_cast %35 : vector<256xf32> to vector<1x256xf32>
    %cst_18 = arith.constant 6.250000e-02 : f32
    %37 = vector.broadcast %cst_18 : f32 to vector<1x256xf32>
    %38 = arith.mulf %33, %37 : vector<1x256xf32>
    %cst_19 = arith.constant 6.250000e-02 : f32
    %39 = vector.broadcast %cst_19 : f32 to vector<1x256xf32>
    %40 = arith.mulf %36, %39 : vector<1x256xf32>
    %41 = arith.mulf %38, %38 : vector<1x256xf32>
    %42 = arith.subf %40, %41 : vector<1x256xf32>
    %cst_20 = arith.constant 0.000000e+00 : f32
    %43 = vector.broadcast %cst_20 : f32 to vector<1x256xf32>
    %44 = arith.maximumf %42, %43 : vector<1x256xf32>
    %c0_21 = arith.constant 0 : index
    %c0_22 = arith.constant 0 : index
    %45 = vector.load %arg4[%c0_21, %c0_22] : memref<2x256xf32, #tpu.memory_space<vmem>>, vector<1x256xf32>
    %c1_23 = arith.constant 1 : index
    %c0_24 = arith.constant 0 : index
    %46 = vector.load %arg4[%c1_23, %c0_24] : memref<2x256xf32, #tpu.memory_space<vmem>>, vector<1x256xf32>
    %cst_25 = arith.constant 9.99999974E-6 : f32
    %47 = vector.broadcast %cst_25 : f32 to vector<1x256xf32>
    %48 = arith.addf %44, %47 : vector<1x256xf32>
    %49 = math.rsqrt %48 : vector<1x256xf32>
    %50 = arith.mulf %45, %49 : vector<1x256xf32>
    %51 = arith.mulf %38, %50 : vector<1x256xf32>
    %52 = arith.subf %46, %51 : vector<1x256xf32>
    %53 = vector.broadcast %50 : vector<1x256xf32> to vector<16x256xf32>
    %54 = arith.mulf %31, %53 : vector<16x256xf32>
    %55 = vector.broadcast %52 : vector<1x256xf32> to vector<16x256xf32>
    %56 = arith.addf %54, %55 : vector<16x256xf32>
    %cst_26 = arith.constant 0.000000e+00 : f32
    %57 = vector.broadcast %cst_26 : f32 to vector<16x256xf32>
    %58 = arith.maximumf %56, %57 : vector<16x256xf32>
    %c0_27 = arith.constant 0 : index
    %c0_28 = arith.constant 0 : index
    %59 = vector.load %arg5[%c0_27, %c0_28] : memref<256x128xf32, #tpu.memory_space<vmem>>, vector<256x128xf32>
    %cst_29 = arith.constant dense<0.000000e+00> : vector<16x128xf32>
    %60 = tpu.matmul %58, %59, %cst_29 {dimension_numbers = #tpu.dot_dimension_numbers<[1], [0], [0], [1], [0, 0, 1, 1], [], []>} : vector<16x256xf32>, vector<256x128xf32>, vector<16x128xf32> -> vector<16x128xf32>
    %cst_30 = arith.constant dense<0.000000e+00> : vector<128xf32>
    %61 = vector.multi_reduction <add>, %60, %cst_30 [0] : vector<16x128xf32> to vector<128xf32>
    %62 = vector.shape_cast %61 : vector<128xf32> to vector<1x128xf32>
    %63 = arith.mulf %60, %60 : vector<16x128xf32>
    %cst_31 = arith.constant dense<0.000000e+00> : vector<128xf32>
    %64 = vector.multi_reduction <add>, %63, %cst_31 [0] : vector<16x128xf32> to vector<128xf32>
    %65 = vector.shape_cast %64 : vector<128xf32> to vector<1x128xf32>
    %cst_32 = arith.constant 6.250000e-02 : f32
    %66 = vector.broadcast %cst_32 : f32 to vector<1x128xf32>
    %67 = arith.mulf %62, %66 : vector<1x128xf32>
    %cst_33 = arith.constant 6.250000e-02 : f32
    %68 = vector.broadcast %cst_33 : f32 to vector<1x128xf32>
    %69 = arith.mulf %65, %68 : vector<1x128xf32>
    %70 = arith.mulf %67, %67 : vector<1x128xf32>
    %71 = arith.subf %69, %70 : vector<1x128xf32>
    %cst_34 = arith.constant 0.000000e+00 : f32
    %72 = vector.broadcast %cst_34 : f32 to vector<1x128xf32>
    %73 = arith.maximumf %71, %72 : vector<1x128xf32>
    %c0_35 = arith.constant 0 : index
    %c0_36 = arith.constant 0 : index
    %74 = vector.load %arg6[%c0_35, %c0_36] : memref<2x128xf32, #tpu.memory_space<vmem>>, vector<1x128xf32>
    %c1_37 = arith.constant 1 : index
    %c0_38 = arith.constant 0 : index
    %75 = vector.load %arg6[%c1_37, %c0_38] : memref<2x128xf32, #tpu.memory_space<vmem>>, vector<1x128xf32>
    %cst_39 = arith.constant 9.99999974E-6 : f32
    %76 = vector.broadcast %cst_39 : f32 to vector<1x128xf32>
    %77 = arith.addf %73, %76 : vector<1x128xf32>
    %78 = math.rsqrt %77 : vector<1x128xf32>
    %79 = arith.mulf %74, %78 : vector<1x128xf32>
    %80 = arith.mulf %67, %79 : vector<1x128xf32>
    %81 = arith.subf %75, %80 : vector<1x128xf32>
    %82 = vector.broadcast %79 : vector<1x128xf32> to vector<16x128xf32>
    %83 = arith.mulf %60, %82 : vector<16x128xf32>
    %84 = vector.broadcast %81 : vector<1x128xf32> to vector<16x128xf32>
    %85 = arith.addf %83, %84 : vector<16x128xf32>
    %c0_40 = arith.constant 0 : index
    %c0_41 = arith.constant 0 : index
    %86 = vector.load %arg7[%c0_40, %c0_41] : memref<16x128xf32, #tpu.memory_space<vmem>>, vector<16x128xf32>
    tpu.vector_store %arg7[%c0_40, %c0_41], %85 {strides = array<i32>} : memref<16x128xf32, #tpu.memory_space<vmem>>, vector<16x128xf32>,
    return
  }
}

</mosaic_0001>

<bundles_post_ra>
// kernel: tpu_custom_call.1
= control target key start
LH: loop header
LB: loop body
LE: loop exit
PB: predicated region body
PF: predicated region fallthrough
CT: control target
= control target key end

     0   :  { %12 = vsyncpa [#allocation3], 0  ;;  %s1107_s0 = inlined_call_operand.hbm [shape: f32[16,128], index: 0, kind: input, shape index: {}]   ;;  %s1108_s1 = inlined_call_operand.hbm [shape: f32[128,256], index: 1, kind: input, shape index: {}]   ;;  %s1109_s2 = inlined_call_operand.hbm [shape: f32[2,256], index: 2, kind: input, shape index: {}]   ;;  %s1110_s3 = inlined_call_operand.hbm [shape: f32[256,256], index: 3, kind: input, shape index: {}]   ;;  %s1111_s4 = inlined_call_operand.vmem [shape: f32[2,256], index: 4, kind: input, shape index: {}]   ;;  %s1112_s5 = inlined_call_operand.hbm [shape: f32[256,128], index: 5, kind: input, shape index: {}]   ;;  %s1113_s6 = inlined_call_operand.vmem [shape: f32[2,128], index: 6, kind: input, shape index: {}]   ;;  %s1114_s7 = inlined_call_operand.hbm [shape: f32[16,128], index: 7, kind: output, shape index: {}]  }
   0x1   :  { %13 = vsyncpa [#allocation6], 0 }
   0x2   :  { %14 = vsyncpa [#allocation9], 0 }
   0x3   :  { %15 = vsyncpa [#allocation4], 0  ;;  %s948_s24 = smov [#allocation5]  }
   0x4   :  { %s33_s25 = sshll.u32 %s948_s24, 4  ;;  %s34_s25 = int_to_ptr.vmem [resolvable:$true] %s33_s25 }
   0x5   :  { %s828_s26 = scalar_lea.vmem %s34_s25, 4096  ;;  %p833_p1 = scmp.lt.s32.totalorder %s34_s25, %s34_s25 }
   0x6   :  { %p829_p0 = scmp.ne.s32.totalorder %s34_s25, %s828_s26  ;;  %p834_p2 = scmp.lt.s32.totalorder %s828_s26, %s828_s26 }
   0x8   :  { %p835_p3 = por %p834_p2, %p833_p1 }
   0xa   :  { %p836_p4 = pnand %p835_p3, %p829_p0 }
   0xc   :  { %839 = shalt.err (!%p836_p4)
}
   0xd   :  { %s949_s27 = smov 256   ;;  %s950_s28 = smov 16  }
   0xe   :  { %39 = dma.hbm_to_vmem [thread:$0]  %s1108_s1, 4096, %s34_s25, [#allocation6], %s949_s27, %s949_s27, %s950_s28  }
   0xf   :  { %s951_s8 = smov [#allocation8]   ;;  %s952_s10 = smov [#allocation2]  }
  0x10   :  { %s55_s9 = sshll.u32 %s951_s8, 4  ;;  %s21_s11 = sshll.u32 %s952_s10, 4  ;;  %s56_s9 = int_to_ptr.vmem [resolvable:$true] %s55_s9  ;;  %s22_s11 = int_to_ptr.vmem [resolvable:$true] %s21_s11 }
  0x11   :  { %s848_s12 = scalar_lea.vmem %s56_s9, 8192  ;;  %p853_p6 = scmp.lt.s32.totalorder %s56_s9, %s56_s9 }
  0x12   :  { %p849_p5 = scmp.ne.s32.totalorder %s56_s9, %s848_s12  ;;  %p854_p7 = scmp.lt.s32.totalorder %s848_s12, %s848_s12 }
  0x14   :  { %p855_p8 = por %p854_p7, %p853_p6 }
  0x16   :  { %p856_p9 = pnand %p855_p8, %p849_p5 }
  0x18   :  { %859 = shalt.err (!%p856_p9)
}
  0x19   :  { %61 = dma.hbm_to_vmem [thread:$0]  %s1110_s3, 8192, %s56_s9, [#allocation9], %s949_s27, %s949_s27, %s950_s28  }
  0x1a   :  { %s868_s15 = scalar_lea.vmem %s22_s11, 256  ;;  %p873_p11 = scmp.lt.s32.totalorder %s22_s11, %s22_s11 }
  0x1b   :  { %p869_p10 = scmp.ne.s32.totalorder %s22_s11, %s868_s15  ;;  %p874_p12 = scmp.lt.s32.totalorder %s868_s15, %s868_s15 }
  0x1d   :  { %p875_p13 = por %p874_p12, %p873_p11 }
  0x1f   :  { %p876_p0 = pnand %p875_p13, %p869_p10 }
  0x21   :  { %879 = shalt.err (!%p876_p0)
}
  0x22   :  { %s953_s1 = smov 128   ;;  %s954_s16 = smov 8  }
  0x23   :  { %27 = dma.hbm_to_vmem [thread:$0]  %s1107_s0, 256, %s22_s11, [#allocation3], %s953_s1, %s953_s1, %s954_s16  }
  0x24   :  { %s955_s19 = smov [#allocation7]   ;;  %s956_s3 = smov [#allocation10]  }
  0x25   :  { %s46_s20 = sshll.u32 %s955_s19, 4  ;;  %s69_s21 = sshll.u32 %s956_s3, 4  ;;  %s47_s20 = int_to_ptr.vmem [resolvable:$true] %s46_s20  ;;  %s70_s21 = int_to_ptr.vmem [resolvable:$true] %s69_s21 }
  0x26   :  { %s888_s22 = scalar_lea.vmem %s47_s20, 64  ;;  %p893_p2 = scmp.lt.s32.totalorder %s47_s20, %s47_s20 }
  0x27   :  { %p889_p1 = scmp.ne.s32.totalorder %s47_s20, %s888_s22  ;;  %p894_p3 = scmp.lt.s32.totalorder %s888_s22, %s888_s22 }
  0x29   :  { %p895_p4 = por %p894_p3, %p893_p2 }
  0x2b   :  { %p896_p5 = pnand %p895_p4, %p889_p1 }
  0x2d   :  { %899 = shalt.err (!%p896_p5)
}
  0x2e   :  { %49 = dma.hbm_to_vmem [thread:$0]  %s1109_s2, 64, %s47_s20, [#allocation6]  }
  0x2f   :  { %s908_s25 = scalar_lea.vmem %s70_s21, 4096  ;;  %p913_p7 = scmp.lt.s32.totalorder %s70_s21, %s70_s21 }
  0x30   :  { %p909_p6 = scmp.ne.s32.totalorder %s70_s21, %s908_s25  ;;  %p914_p8 = scmp.lt.s32.totalorder %s908_s25, %s908_s25 }
  0x32   :  { %p915_p9 = por %p914_p8, %p913_p7 }
  0x34   :  { %p916_p10 = pnand %p915_p9, %p909_p6 }
  0x36   :  { %919 = shalt.err (!%p916_p10)
}
  0x37   :  { %75 = dma.hbm_to_vmem [thread:$0]  %s1112_s5, 4096, %s70_s21, [#allocation9], %s953_s1, %s953_s1, %s954_s16  }
  0x38   :  { %940 = dma.done.wait [#allocation3], 256  }
  0x39   :  { %941 = vsyncadd [#allocation3], 4294967040 }
  0x3a   :  { %942 = dma.done.wait [#allocation6], 4160  }
  0x3b   :  { %943 = vsyncadd [#allocation6], 4294963136 }
  0x3c   :  { %944 = dma.done.wait [#allocation9], 12288  }
  0x3d   :  { %945 = vsyncadd [#allocation9], 4294955008  ;;  %v957_v0 = vmov 0.0   ;;  %v126_v1 = vld [vmem:[#allocation5 + $0xf8] sm:$0xff]  ;;  %v125_v2 = vld [vmem:[#allocation5 + $0xf0] sm:$0xff]  ;;  %s959_s9 = smov [#allocation11]  }
  0x3e   :  { %191 = vmatprep.mubr.f32.mxu0 %v957_v0  ;;  %v124_v3 = vld [vmem:[#allocation5 + $0xe8] sm:$0xff]  ;;  %127 = vmatprep.subr.mxu0 %v126_v1  ;;  %v123_v4 = vld [vmem:[#allocation5 + $0xe0] sm:$0xff]  ;;  %v122_v5 = vld [vmem:[#allocation5 + $0xd8] sm:$0xff]  ;;  %s745_s10 = sshll.u32 %s959_s9, 4  ;;  %s746_s10 = int_to_ptr.vmem [resolvable:$true] %s745_s10 }
  0x3f   :  { %128 = vmatpush1.msra.mxu0 %v125_v2  ;;  %v121_v6 = vld [vmem:[#allocation5 + $0xd0] sm:$0xff]  ;;  %v120_v7 = vld [vmem:[#allocation5 + $0xc8] sm:$0xff]  ;;  %v119_v8 = vld [vmem:[#allocation5 + $0xc0] sm:$0xff]  ;;  %s920_s11 = scalar_lea.vmem %s746_s10, 256  ;;  %p925_p12 = scmp.lt.s32.totalorder %s746_s10, %s746_s10 }
  0x40   :  { %129 = vmatprep.subr.mxu0 %v124_v3  ;;  %v118_v9 = vld [vmem:[#allocation5 + $0xb8] sm:$0xff]  ;;  %v117_v10 = vld [vmem:[#allocation5 + $0xb0] sm:$0xff]  ;;  %v116_v11 = vld [vmem:[#allocation5 + $0xa8] sm:$0xff]  ;;  %p921_p11 = scmp.ne.s32.totalorder %s746_s10, %s920_s11  ;;  %p926_p13 = scmp.lt.s32.totalorder %s920_s11, %s920_s11 }
  0x41   :  { %130 = vmatpush1.msra.mxu0 %v123_v4  ;;  %v115_v12 = vld [vmem:[#allocation5 + $0xa0] sm:$0xff]  ;;  %v114_v13 = vld [vmem:[#allocation5 + $0x98] sm:$0xff]  ;;  %v113_v14 = vld [vmem:[#allocation5 + $0x90] sm:$0xff] }
  0x42   :  { %131 = vmatprep.subr.mxu0 %v122_v5  ;;  %v112_v15 = vld [vmem:[#allocation5 + $0x88] sm:$0xff]  ;;  %v111_v16 = vld [vmem:[#allocation5 + $0x80] sm:$0xff]  ;;  %v110_v17 = vld [vmem:[#allocation5 + $0x78] sm:$0xff]  ;;  %p927_p0 = por %p926_p13, %p925_p12 }
  0x43   :  { %132 = vmatpush1.msra.mxu0 %v121_v6  ;;  %v109_v18 = vld [vmem:[#allocation5 + $0x70] sm:$0xff]  ;;  %v108_v19 = vld [vmem:[#allocation5 + $0x68] sm:$0xff]  ;;  %v107_v20 = vld [vmem:[#allocation5 + $0x60] sm:$0xff] }
  0x44   :  { %133 = vmatprep.subr.mxu0 %v120_v7  ;;  %v106_v21 = vld [vmem:[#allocation5 + $0x58] sm:$0xff]  ;;  %v105_v22 = vld [vmem:[#allocation5 + $0x50] sm:$0xff]  ;;  %v104_v23 = vld [vmem:[#allocation5 + $0x48] sm:$0xff]  ;;  %p928_p1 = pnand %p927_p0, %p921_p11 }
  0x45   :  { %134 = vmatpush1.msra.mxu0 %v119_v8  ;;  %v103_v24 = vld [vmem:[#allocation5 + $0x40] sm:$0xff]  ;;  %v102_v25 = vld [vmem:[#allocation5 + $0x38] sm:$0xff]  ;;  %v101_v26 = vld [vmem:[#allocation5 + $0x30] sm:$0xff] }
  0x46   :  { %135 = vmatprep.subr.mxu0 %v118_v9  ;;  %v100_v27 = vld [vmem:[#allocation5 + $0x28] sm:$0xff]  ;;  %v99_v28 = vld [vmem:[#allocation5 + $0x20] sm:$0xff]  ;;  %v98_v29 = vld [vmem:[#allocation5 + $0x18] sm:$0xff] }
  0x47   :  { %136 = vmatpush1.msra.mxu0 %v117_v10  ;;  %v97_v30 = vld [vmem:[#allocation5 + $0x10] sm:$0xff]  ;;  %v96_v31 = vld [vmem:[#allocation5 + $0x8] sm:$0xff]  ;;  %v95_v32 = vld [vmem:[#allocation5] sm:$0xff] }
  0x48   :  { %137 = vmatprep.subr.mxu0 %v116_v11  ;;  %v93_v33 = vld [vmem:[#allocation2] sm:$0xff]  ;;  %v94_v34 = vld [vmem:[#allocation2 + $0x8] sm:$0xff]  ;;  %v355_v38 = vld [vmem:[#allocation8 + $0xe0] sm:$0xff] }
  0x49   :  { %138 = vmatpush1.msra.mxu0 %v115_v12  ;;  %v358_v35 = vld [vmem:[#allocation8 + $0xf8] sm:$0xff]  ;;  %v357_v36 = vld [vmem:[#allocation8 + $0xf0] sm:$0xff]  ;;  %v356_v37 = vld [vmem:[#allocation8 + $0xe8] sm:$0xff] }
  0x4a   :  { %139 = vmatprep.subr.mxu0 %v114_v13  ;;  %391 = vmatprep.subr.mxu1 %v358_v35  ;;  %v354_v39 = vld [vmem:[#allocation8 + $0xd8] sm:$0xff]  ;;  %v353_v40 = vld [vmem:[#allocation8 + $0xd0] sm:$0xff]  ;;  %v352_v41 = vld [vmem:[#allocation8 + $0xc8] sm:$0xff] }
  0x4b   :  { %140 = vmatpush1.msra.mxu0 %v113_v14  ;;  %392 = vmatpush1.msra.mxu1 %v357_v36  ;;  %v351_v42 = vld [vmem:[#allocation8 + $0xc0] sm:$0xff]  ;;  %v350_v43 = vld [vmem:[#allocation8 + $0xb8] sm:$0xff]  ;;  %v349_v44 = vld [vmem:[#allocation8 + $0xb0] sm:$0xff] }
  0x4c   :  { %141 = vmatprep.subr.mxu0 %v112_v15  ;;  %393 = vmatprep.subr.mxu1 %v356_v37  ;;  %v348_v45 = vld [vmem:[#allocation8 + $0xa8] sm:$0xff]  ;;  %v347_v46 = vld [vmem:[#allocation8 + $0xa0] sm:$0xff]  ;;  %v346_v47 = vld [vmem:[#allocation8 + $0x98] sm:$0xff] }
  0x4d   :  { %142 = vmatpush1.msra.mxu0 %v111_v16  ;;  %394 = vmatpush1.msra.mxu1 %v355_v38  ;;  %v345_v48 = vld [vmem:[#allocation8 + $0x90] sm:$0xff]  ;;  %v344_v49 = vld [vmem:[#allocation8 + $0x88] sm:$0xff]  ;;  %v343_v50 = vld [vmem:[#allocation8 + $0x80] sm:$0xff] }
  0x4e   :  { %143 = vmatprep.subr.mxu0 %v110_v17  ;;  %395 = vmatprep.subr.mxu1 %v354_v39  ;;  %v342_v51 = vld [vmem:[#allocation8 + $0x78] sm:$0xff]  ;;  %v341_v52 = vld [vmem:[#allocation8 + $0x70] sm:$0xff]  ;;  %v340_v53 = vld [vmem:[#allocation8 + $0x68] sm:$0xff] }
  0x4f   :  { %144 = vmatpush1.msra.mxu0 %v109_v18  ;;  %396 = vmatpush1.msra.mxu1 %v353_v40  ;;  %v339_v54 = vld [vmem:[#allocation8 + $0x60] sm:$0xff]  ;;  %v338_v55 = vld [vmem:[#allocation8 + $0x58] sm:$0xff]  ;;  %v337_v56 = vld [vmem:[#allocation8 + $0x50] sm:$0xff] }
  0x50   :  { %145 = vmatprep.subr.mxu0 %v108_v19  ;;  %397 = vmatprep.subr.mxu1 %v352_v41  ;;  %v336_v57 = vld [vmem:[#allocation8 + $0x48] sm:$0xff]  ;;  %v335_v58 = vld [vmem:[#allocation8 + $0x40] sm:$0xff]  ;;  %v334_v59 = vld [vmem:[#allocation8 + $0x38] sm:$0xff] }
  0x51   :  { %146 = vmatpush1.msra.mxu0 %v107_v20  ;;  %398 = vmatpush1.msra.mxu1 %v351_v42  ;;  %v333_v60 = vld [vmem:[#allocation8 + $0x30] sm:$0xff]  ;;  %v332_v61 = vld [vmem:[#allocation8 + $0x28] sm:$0xff]  ;;  %v331_v62 = vld [vmem:[#allocation8 + $0x20] sm:$0xff] }
  0x52   :  { %147 = vmatprep.subr.mxu0 %v106_v21  ;;  %399 = vmatprep.subr.mxu1 %v350_v43  ;;  %v330_v63 = vld [vmem:[#allocation8 + $0x18] sm:$0xff]  ;;  %v328_v1 = vld [vmem:[#allocation8 + $0x8] sm:$0xff]  ;;  %v327_v2 = vld [vmem:[#allocation8] sm:$0xff] }
  0x53   :  { %148 = vmatpush1.msra.mxu0 %v105_v22  ;;  %400 = vmatpush1.msra.mxu1 %v349_v44  ;;  %v390_v3 = vld [vmem:[#allocation8 + $0x1f8] sm:$0xff]  ;;  %v389_v4 = vld [vmem:[#allocation8 + $0x1f0] sm:$0xff]  ;;  %v388_v5 = vld [vmem:[#allocation8 + $0x1e8] sm:$0xff] }
  0x54   :  { %149 = vmatprep.subr.mxu0 %v104_v23  ;;  %401 = vmatprep.subr.mxu1 %v348_v45  ;;  %v387_v6 = vld [vmem:[#allocation8 + $0x1e0] sm:$0xff]  ;;  %v386_v7 = vld [vmem:[#allocation8 + $0x1d8] sm:$0xff]  ;;  %v385_v8 = vld [vmem:[#allocation8 + $0x1d0] sm:$0xff] }
  0x55   :  { %150 = vmatpush1.msra.mxu0 %v103_v24  ;;  %402 = vmatpush1.msra.mxu1 %v347_v46  ;;  %v384_v9 = vld [vmem:[#allocation8 + $0x1c8] sm:$0xff]  ;;  %v383_v10 = vld [vmem:[#allocation8 + $0x1c0] sm:$0xff]  ;;  %v382_v11 = vld [vmem:[#allocation8 + $0x1b8] sm:$0xff] }
  0x56   :  { %151 = vmatprep.subr.mxu0 %v102_v25  ;;  %403 = vmatprep.subr.mxu1 %v346_v47  ;;  %v381_v12 = vld [vmem:[#allocation8 + $0x1b0] sm:$0xff]  ;;  %v380_v13 = vld [vmem:[#allocation8 + $0x1a8] sm:$0xff]  ;;  %v379_v14 = vld [vmem:[#allocation8 + $0x1a0] sm:$0xff] }
  0x57   :  { %152 = vmatpush1.msra.mxu0 %v101_v26  ;;  %404 = vmatpush1.msra.mxu1 %v345_v48  ;;  %v378_v15 = vld [vmem:[#allocation8 + $0x198] sm:$0xff]  ;;  %v377_v16 = vld [vmem:[#allocation8 + $0x190] sm:$0xff]  ;;  %v376_v17 = vld [vmem:[#allocation8 + $0x188] sm:$0xff] }
  0x58   :  { %153 = vmatprep.subr.mxu0 %v100_v27  ;;  %405 = vmatprep.subr.mxu1 %v344_v49  ;;  %v375_v18 = vld [vmem:[#allocation8 + $0x180] sm:$0xff]  ;;  %v374_v19 = vld [vmem:[#allocation8 + $0x178] sm:$0xff]  ;;  %v373_v20 = vld [vmem:[#allocation8 + $0x170] sm:$0xff] }
  0x59   :  { %154 = vmatpush1.msra.mxu0 %v99_v28  ;;  %406 = vmatpush1.msra.mxu1 %v343_v50  ;;  %v372_v21 = vld [vmem:[#allocation8 + $0x168] sm:$0xff]  ;;  %v371_v22 = vld [vmem:[#allocation8 + $0x160] sm:$0xff]  ;;  %v370_v23 = vld [vmem:[#allocation8 + $0x158] sm:$0xff] }
  0x5a   :  { %155 = vmatprep.subr.mxu0 %v98_v29  ;;  %407 = vmatprep.subr.mxu1 %v342_v51  ;;  %v369_v24 = vld [vmem:[#allocation8 + $0x150] sm:$0xff]  ;;  %v368_v25 = vld [vmem:[#allocation8 + $0x148] sm:$0xff]  ;;  %v367_v26 = vld [vmem:[#allocation8 + $0x140] sm:$0xff] }
  0x5b   :  { %156 = vmatpush1.msra.mxu0 %v97_v30  ;;  %408 = vmatpush1.msra.mxu1 %v341_v52  ;;  %v366_v27 = vld [vmem:[#allocation8 + $0x138] sm:$0xff]  ;;  %v365_v28 = vld [vmem:[#allocation8 + $0x130] sm:$0xff]  ;;  %v364_v29 = vld [vmem:[#allocation8 + $0x128] sm:$0xff] }
  0x5c   :  { %157 = vmatprep.subr.mxu0 %v96_v31  ;;  %409 = vmatprep.subr.mxu1 %v340_v53  ;;  %v363_v30 = vld [vmem:[#allocation8 + $0x120] sm:$0xff]  ;;  %v362_v31 = vld [vmem:[#allocation8 + $0x118] sm:$0xff] }
  0x5d   :  { %158 = vmatpush1.msra.mxu0 %v95_v32  ;;  %410 = vmatpush1.msra.mxu1 %v339_v54  ;;  %v361_v32 = vld [vmem:[#allocation8 + $0x110] sm:$0xff] }
  0x5e   :  { %192 = vmatmul.mubr.f32.vlgmr.msra.gmra.mxu0 %v93_v33  ;;  %411 = vmatprep.subr.mxu1 %v338_v55  ;;  %v360_v33 = vld [vmem:[#allocation8 + $0x108] sm:$0xff] }
  0x5f   :  { %197 = vmatprep.mubr.f32.mxu0 %v957_v0  ;;  %412 = vmatpush1.msra.mxu1 %v337_v56  ;;  %v329_v0 = vld [vmem:[#allocation8 + $0x10] sm:$0xff] }
  0x60   :  { %413 = vmatprep.subr.mxu1 %v336_v57 }
  0x61   :  { %414 = vmatpush1.msra.mxu1 %v335_v58 }
  0x62   :  { %198 = vmatmul.mubr.f32.gmra.mxu0 %v94_v34  ;;  %415 = vmatprep.subr.mxu1 %v334_v59  ;;  %v359_v34 = vld [vmem:[#allocation8 + $0x100] sm:$0xff] }
  0x63   :  { %416 = vmatpush1.msra.mxu1 %v333_v60 }
  0x64   :  { %417 = vmatprep.subr.mxu1 %v332_v61 }
  0x65   :  { %418 = vmatpush1.msra.mxu1 %v331_v62 }
  0x66   :  { %419 = vmatprep.subr.mxu1 %v330_v63 }
  0x67   :  { %420 = vmatpush1.msra.mxu1 %v329_v0 }
  0x68   :  { %421 = vmatprep.subr.mxu1 %v328_v1 }
  0x69   :  { %422 = vmatpush1.msra.mxu1 %v327_v2 }
  0x6a   :  { %423 = vmatprep.subr.mxu1 %v390_v3 }
  0x6b   :  { %424 = vmatpush2.msra.mxu1 %v389_v4 }
  0x6c   :  { %425 = vmatprep.subr.mxu1 %v388_v5 }
  0x6d   :  { %426 = vmatpush2.msra.mxu1 %v387_v6 }
  0x6e   :  { %427 = vmatprep.subr.mxu1 %v386_v7 }
  0x6f   :  { %428 = vmatpush2.msra.mxu1 %v385_v8 }
  0x70   :  { %429 = vmatprep.subr.mxu1 %v384_v9 }
  0x71   :  { %430 = vmatpush2.msra.mxu1 %v383_v10 }
  0x72   :  { %431 = vmatprep.subr.mxu1 %v382_v11 }
  0x73   :  { %432 = vmatpush2.msra.mxu1 %v381_v12 }
  0x74   :  { %433 = vmatprep.subr.mxu1 %v380_v13 }
  0x75   :  { %434 = vmatpush2.msra.mxu1 %v379_v14 }
  0x76   :  { %435 = vmatprep.subr.mxu1 %v378_v15 }
  0x77   :  { %436 = vmatpush2.msra.mxu1 %v377_v16 }
  0x78   :  { %437 = vmatprep.subr.mxu1 %v376_v17 }
  0x79   :  { %438 = vmatpush2.msra.mxu1 %v375_v18 }
  0x7a   :  { %439 = vmatprep.subr.mxu1 %v374_v19  ;;  %v958_v19 = vmov 1966171168  }
  0x7b   :  { %440 = vmatpush2.msra.mxu1 %v373_v20  ;;  %v257_v20 = vunpack.c.l.s4 %v958_v19  ;;  %v609_v19 = vld [vmem:[#allocation10 + $0x90] sm:$0xff] }
  0x7c   :  { %441 = vmatprep.subr.mxu1 %v372_v21  ;;  %v259_v21 = vlaneseq }
  0x7d   :  { %442 = vmatpush2.msra.mxu1 %v371_v22  ;;  %v258_v22 = vunpack.c.0.s8 %v257_v20  ;;  %v593_v20 = vld [vmem:[#allocation10 + $0x10] sm:$0xff] }
  0x7e   :  { %443 = vmatprep.subr.mxu1 %v370_v23  ;;  %v260_v23 = vshrl.u32 %v259_v21, 7  ;;  %v608_v21 = vld [vmem:[#allocation10 + $0x88] sm:$0xff] }
  0x7f   :  { %444 = vmatpush2.msra.mxu1 %v369_v24 }
  0x80   :  { %445 = vmatprep.subr.mxu1 %v368_v25  ;;  %v1043_v25 = vsub.s32 %v258_v22, %v260_v23  ;;  %v592_v22 = vld [vmem:[#allocation10 + $0x8] sm:$0xff] }
  0x81   :  { %446 = vmatpush2.msra.mxu1 %v367_v26 }
  0x82   :  { %447 = vmatprep.subr.mxu1 %v366_v27 }
  0x83   :  { %448 = vmatpush2.msra.mxu1 %v365_v28 }
  0x84   :  { %449 = vmatprep.subr.mxu1 %v364_v29  ;;  %v246_v29 = vld [vmem:[#allocation7] ss:$2 sm:$0x3] }
  0x85   :  { %450 = vmatpush2.msra.mxu1 %v363_v30 }
  0x86   :  { %451 = vmatprep.subr.mxu1 %v362_v31  ;;  %v1047_v31 = vsub.s32 0, %v260_v23 }
  0x87   :  { %452 = vmatpush2.msra.mxu1 %v361_v32  ;;  %v1049_v32 = vsub.s32 1, %v260_v23  ;;  %v607_v23 = vld [vmem:[#allocation10 + $0x80] sm:$0xff] }
  0x88   :  { %453 = vmatprep.subr.mxu1 %v360_v33 }
  0x89   :  { %454 = vmatpush2.msra.mxu1 %v359_v34 }
 0x11e   :  { %v1023_v35 = vpop.f32.mrf.mxu0 }
 0x11f   :  { %v218_v38 = vmul.f32 %v1023_v35, %v1023_v35 }
 0x120   :  { %v1025_v36 = vpop.f32.mrf.mxu0 }
 0x121   :  { %v219_v41 = vmul.f32 %v1025_v36, %v1025_v36 }
 0x122   :  { %v1027_v37 = vpop.f32.mrf.mxu0 }
 0x123   :  { %v204_v39 = vadd.f32 %v1027_v37, %v1023_v35  ;;  %v220_v40 = vmul.f32 %v1027_v37, %v1027_v37 }
 0x124   :  { %v1037_v42 = vpop.f32.mrf.mxu0 }
 0x125   :  { %v205_v43 = vrot.slane %v204_v39, 4  ;;  %v222_v44 = vadd.f32 %v220_v40, %v218_v38  ;;  %v211_v45 = vadd.f32 %v1037_v42, %v1025_v36  ;;  %v221_v46 = vmul.f32 %v1037_v42, %v1037_v42 }
 0x127   :  { %v206_v47 = vadd.f32 %v205_v43, %v204_v39  ;;  %v223_v48 = vrot.slane %v222_v44, 4  ;;  %v212_v49 = vrot.slane %v211_v45, 4  ;;  %v229_v50 = vadd.f32 %v221_v46, %v219_v41 }
 0x129   :  { %v207_v51 = vrot.slane %v206_v47, 2  ;;  %v224_v52 = vadd.f32 %v223_v48, %v222_v44  ;;  %v213_v53 = vadd.f32 %v212_v49, %v211_v45  ;;  %v230_v54 = vrot.slane %v229_v50, 4  ;;  %v248_v44 = vld [vmem:[#allocation7 + $0x1] ss:$2 sm:$0x3] }
 0x12b   :  { %v208_v55 = vadd.f32 %v207_v51, %v206_v47  ;;  %v225_v56 = vrot.slane %v224_v52, 2  ;;  %v214_v57 = vrot.slane %v213_v53, 2  ;;  %v231_v58 = vadd.f32 %v230_v54, %v229_v50 }
 0x12d   :  { %v209_v59 = vrot.slane %v208_v55, 1  ;;  %v226_v60 = vadd.f32 %v225_v56, %v224_v52  ;;  %v215_v61 = vadd.f32 %v214_v57, %v213_v53  ;;  %v232_v62 = vrot.slane %v231_v58, 2 }
 0x12f   :  { %v210_v63 = vadd.f32 %v209_v59, %v208_v55  ;;  %v227_v0 = vrot.slane %v226_v60, 1  ;;  %v216_v1 = vrot.slane %v215_v61, 1  ;;  %v233_v2 = vadd.f32 %v232_v62, %v231_v58  ;;  %v620_v62 = vld [vmem:[#allocation10 + $0xe8] sm:$0xff] }
 0x131   :  { %v228_v3 = vadd.f32 %v227_v0, %v226_v60  ;;  %v236_v4 = vmul.f32 0.0625, %v210_v63  ;;  %v217_v5 = vadd.f32 %v216_v1, %v215_v61  ;;  %v234_v6 = vrot.slane %v233_v2, 1  ;;  %v606_v60 = vld [vmem:[#allocation10 + $0x78] sm:$0xff]  ;;  %v605_v61 = vld [vmem:[#allocation10 + $0x70] sm:$0xff]  ;;  %v619_v63 = vld [vmem:[#allocation10 + $0xe0] sm:$0xff] }
 0x132   :  { %v603_v0 = vld [vmem:[#allocation10 + $0x60] sm:$0xff]  ;;  %v618_v1 = vld [vmem:[#allocation10 + $0xd8] sm:$0xff] }
 0x133   :  { %v238_v7 = vmul.f32 0.0625, %v228_v3  ;;  %v240_v8 = vmul.f32 %v236_v4, %v236_v4  ;;  %v235_v9 = vadd.f32 %v234_v6, %v233_v2  ;;  %v237_v10 = vmul.f32 0.0625, %v217_v5  ;;  %v602_v2 = vld [vmem:[#allocation10 + $0x58] sm:$0xff]  ;;  %v617_v3 = vld [vmem:[#allocation10 + $0xd0] sm:$0xff]  ;;  %v616_v5 = vld [vmem:[#allocation10 + $0xc8] sm:$0xff] }
 0x134   :  { %v600_v6 = vld [vmem:[#allocation10 + $0x48] sm:$0xff] }
 0x135   :  { %v242_v11 = vsub.f32 %v238_v7, %v240_v8  ;;  %v239_v12 = vmul.f32 0.0625, %v235_v9  ;;  %v241_v13 = vmul.f32 %v237_v10, %v237_v10  ;;  %v615_v7 = vld [vmem:[#allocation10 + $0xc0] sm:$0xff]  ;;  %v614_v9 = vld [vmem:[#allocation10 + $0xb8] sm:$0xff] }
 0x136   :  { %v599_v8 = vld [vmem:[#allocation10 + $0x40] sm:$0xff] }
 0x137   :  { %v244_v14 = vmax.f32 %v242_v11, 0.0  ;;  %v243_v15 = vsub.f32 %v239_v12, %v241_v13  ;;  %v613_v11 = vld [vmem:[#allocation10 + $0xb0] sm:$0xff]  ;;  %v612_v13 = vld [vmem:[#allocation10 + $0xa8] sm:$0xff] }
 0x138   :  { %v597_v12 = vld [vmem:[#allocation10 + $0x30] sm:$0xff] }
 0x139   :  { %v249_v16 = vadd.f32 1e-05, %v244_v14  ;;  %v245_v17 = vmax.f32 %v243_v15, 0.0  ;;  %v596_v14 = vld [vmem:[#allocation10 + $0x28] sm:$0xff]  ;;  %v611_v15 = vld [vmem:[#allocation10 + $0xa0] sm:$0xff] }
 0x13b   :  { %v250_v18 = vadd.f32 1e-05, %v245_v17  ;;  %810 = vrsqrt.f32 %v249_v16  ;;  %v595_v16 = vld [vmem:[#allocation10 + $0x20] sm:$0xff]  ;;  %v610_v17 = vld [vmem:[#allocation10 + $0x98] sm:$0xff] }
 0x13d   :  { %812 = vrsqrt.f32 %v250_v18  ;;  %v594_v18 = vld [vmem:[#allocation10 + $0x18] sm:$0xff] }
 0x148   :  { %v811_v24 = vpop.eup %810 }
 0x14a   :  { %v813_v26 = vpop.eup %812 }
 0x14b   :  { %v255_v27 = vcombine.low %v811_v24, %v813_v26  ;;  %v591_v24 = vld [vmem:[#allocation10] sm:$0xff] }
 0x14d   :  { %v262_v28 = vrot.slane %v255_v27, %v1043_v25 }
 0x14f   :  { %v269_v30 = vrot.slane %v262_v28, %v1043_v25 }
 0x151   :  { %v271_v33 = vmul.f32 %v269_v30, %v246_v29 }
 0x153   :  { %v276_v34 = vrot.slane %v271_v33, %v1047_v31  ;;  %v280_v38 = vrot.slane %v271_v33, %v1049_v32 }
 0x155   :  { %v284_v39 = vmul.f32 %v280_v38, %v237_v10  ;;  %v283_v40 = vmul.f32 %v276_v34, %v236_v4  ;;  %v307_v47 = vmul.f32 %v280_v38, %v1037_v42  ;;  %v305_v48 = vmul.f32 %v280_v38, %v1025_v36  ;;  %v622_v36 = vld [vmem:[#allocation10 + $0xf8] sm:$0xff]  ;;  %v601_v4 = vld [vmem:[#allocation10 + $0x50] sm:$0xff] }
 0x156   :  { %v304_v50 = vmul.f32 %v276_v34, %v1023_v35  ;;  %v306_v55 = vmul.f32 %v276_v34, %v1027_v37  ;;  %760 = vmatprep.subr.mxu0 %v622_v36  ;;  %v621_v35 = vld [vmem:[#allocation10 + $0xf0] sm:$0xff]  ;;  %v604_v37 = vld [vmem:[#allocation10 + $0x68] sm:$0xff]  ;;  %v598_v10 = vld [vmem:[#allocation10 + $0x38] sm:$0xff] }
 0x157   :  { %v287_v41 = vcombine.low %v283_v40, %v284_v39  ;;  %761 = vmatpush3.msra.mxu0 %v606_v60 }
 0x158   :  { %762 = vmatprep.subr.mxu0 %v621_v35 }
 0x159   :  { %v294_v43 = vrot.slane %v287_v41, %v1043_v25  ;;  %763 = vmatpush3.msra.mxu0 %v605_v61 }
 0x15a   :  { %764 = vmatprep.subr.mxu0 %v620_v62 }
 0x15b   :  { %v301_v45 = vrot.slane %v294_v43, %v1043_v25  ;;  %765 = vmatpush3.msra.mxu0 %v604_v37 }
 0x15c   :  { %766 = vmatprep.subr.mxu0 %v619_v63 }
 0x15d   :  { %v303_v46 = vsub.f32 %v248_v44, %v301_v45  ;;  %767 = vmatpush3.msra.mxu0 %v603_v0 }
 0x15e   :  { %768 = vmatprep.subr.mxu0 %v618_v1 }
 0x15f   :  { %v316_v49 = vrot.slane %v303_v46, %v1049_v32  ;;  %v312_v51 = vrot.slane %v303_v46, %v1047_v31  ;;  %769 = vmatpush3.msra.mxu0 %v602_v2 }
 0x160   :  { %770 = vmatprep.subr.mxu0 %v617_v3 }
 0x161   :  { %v320_v52 = vadd.f32 %v316_v49, %v305_v48  ;;  %v319_v53 = vadd.f32 %v312_v51, %v304_v50  ;;  %v322_v54 = vadd.f32 %v316_v49, %v307_v47  ;;  %v321_v58 = vadd.f32 %v312_v51, %v306_v55  ;;  %771 = vmatpush3.msra.mxu0 %v601_v4 }
 0x162   :  { %772 = vmatprep.subr.mxu0 %v616_v5 }
 0x163   :  { %v324_v56 = vmax.f32 %v320_v52, 0.0  ;;  %v323_v57 = vmax.f32 %v319_v53, 0.0  ;;  %v326_v59 = vmax.f32 %v322_v54, 0.0  ;;  %v325_v42 = vmax.f32 %v321_v58, 0.0  ;;  %773 = vmatpush3.msra.mxu0 %v600_v6 }
 0x164   :  { %774 = vmatprep.subr.mxu0 %v615_v7 }
 0x165   :  { %455 = vmatprep.mubr.f32.mxu1 %v324_v56  ;;  %775 = vmatpush3.msra.mxu0 %v599_v8 }
 0x166   :  { %456 = vmatmul.mubr.f32.vlgmr.msra.gmra.mxu1 %v323_v57  ;;  %776 = vmatprep.subr.mxu0 %v614_v9 }
 0x167   :  { %461 = vmatprep.mubr.f32.mxu1 %v326_v59  ;;  %777 = vmatpush3.msra.mxu0 %v598_v10 }
 0x168   :  { %778 = vmatprep.subr.mxu0 %v613_v11 }
 0x169   :  { %779 = vmatpush3.msra.mxu0 %v597_v12 }
 0x16a   :  { %462 = vmatmul.mubr.f32.gmra.mxu1 %v325_v42  ;;  %780 = vmatprep.subr.mxu0 %v612_v13 }
 0x16b   :  { %781 = vmatpush3.msra.mxu0 %v596_v14 }
 0x16c   :  { %782 = vmatprep.subr.mxu0 %v611_v15 }
 0x16d   :  { %783 = vmatpush3.msra.mxu0 %v595_v16  ;;  %v510_v16 = vld [vmem:[%s1111_s4] ss:$2 sm:$0x3] }
 0x16e   :  { %784 = vmatprep.subr.mxu0 %v610_v17 }
 0x16f   :  { %785 = vmatpush3.msra.mxu0 %v594_v18 }
 0x170   :  { %786 = vmatprep.subr.mxu0 %v609_v19 }
 0x171   :  { %787 = vmatpush3.msra.mxu0 %v593_v20 }
 0x172   :  { %788 = vmatprep.subr.mxu0 %v608_v21 }
 0x173   :  { %789 = vmatpush3.msra.mxu0 %v592_v22 }
 0x174   :  { %790 = vmatprep.subr.mxu0 %v607_v23 }
 0x175   :  { %791 = vmatpush3.msra.mxu0 %v591_v24 }
 0x226   :  { %v1061_v26 = vpop.f32.mrf.mxu1 }
 0x227   :  { %v482_v29 = vmul.f32 %v1061_v26, %v1061_v26 }
 0x228   :  { %v1063_v27 = vpop.f32.mrf.mxu1 }
 0x229   :  { %v483_v34 = vmul.f32 %v1063_v27, %v1063_v27 }
 0x22a   :  { %v1065_v28 = vpop.f32.mrf.mxu1 }
 0x22b   :  { %v468_v30 = vadd.f32 %v1065_v28, %v1061_v26  ;;  %v484_v33 = vmul.f32 %v1065_v28, %v1065_v28 }
 0x22c   :  { %v465_v38 = vpop.f32.mrf.mxu1 }
 0x22d   :  { %v469_v39 = vrot.slane %v468_v30, 4  ;;  %v486_v40 = vadd.f32 %v484_v33, %v482_v29  ;;  %v475_v41 = vadd.f32 %v465_v38, %v1063_v27  ;;  %v485_v43 = vmul.f32 %v465_v38, %v465_v38  ;;  %v759_v29 = vld [vmem:[%s1111_s4 + $0x1] ss:$2 sm:$0x3] }
 0x22f   :  { %v470_v44 = vadd.f32 %v469_v39, %v468_v30  ;;  %v487_v45 = vrot.slane %v486_v40, 4  ;;  %v476_v46 = vrot.slane %v475_v41, 4  ;;  %v493_v47 = vadd.f32 %v485_v43, %v483_v34 }
 0x231   :  { %v471_v48 = vrot.slane %v470_v44, 2  ;;  %v488_v49 = vadd.f32 %v487_v45, %v486_v40  ;;  %v477_v50 = vadd.f32 %v476_v46, %v475_v41  ;;  %v494_v51 = vrot.slane %v493_v47, 4 }
 0x233   :  { %v472_v52 = vadd.f32 %v471_v48, %v470_v44  ;;  %v489_v53 = vrot.slane %v488_v49, 2  ;;  %v478_v54 = vrot.slane %v477_v50, 2  ;;  %v495_v55 = vadd.f32 %v494_v51, %v493_v47 }
 0x235   :  { %v473_v56 = vrot.slane %v472_v52, 1  ;;  %v490_v57 = vadd.f32 %v489_v53, %v488_v49  ;;  %v479_v58 = vadd.f32 %v478_v54, %v477_v50  ;;  %v496_v59 = vrot.slane %v495_v55, 2 }
 0x237   :  { %v474_v42 = vadd.f32 %v473_v56, %v472_v52  ;;  %v491_v36 = vrot.slane %v490_v57, 1  ;;  %v480_v60 = vrot.slane %v479_v58, 1  ;;  %v497_v35 = vadd.f32 %v496_v59, %v495_v55 }
 0x239   :  { %v492_v61 = vadd.f32 %v491_v36, %v490_v57  ;;  %v500_v62 = vmul.f32 0.0625, %v474_v42  ;;  %v481_v37 = vadd.f32 %v480_v60, %v479_v58  ;;  %v498_v63 = vrot.slane %v497_v35, 1 }
 0x23b   :  { %v502_v0 = vmul.f32 0.0625, %v492_v61  ;;  %v504_v1 = vmul.f32 %v500_v62, %v500_v62  ;;  %v499_v2 = vadd.f32 %v498_v63, %v497_v35  ;;  %v501_v3 = vmul.f32 0.0625, %v481_v37 }
 0x23d   :  { %v506_v4 = vsub.f32 %v502_v0, %v504_v1  ;;  %v503_v5 = vmul.f32 0.0625, %v499_v2  ;;  %v505_v6 = vmul.f32 %v501_v3, %v501_v3 }
 0x23f   :  { %v508_v7 = vmax.f32 %v506_v4, 0.0  ;;  %v507_v8 = vsub.f32 %v503_v5, %v505_v6 }
 0x241   :  { %v513_v9 = vadd.f32 1e-05, %v508_v7  ;;  %v509_v10 = vmax.f32 %v507_v8, 0.0  ;;  %v719_v7 = vld [vmem:[%s1113_s6] sm:$0x1] }
 0x243   :  { %v514_v11 = vadd.f32 1e-05, %v509_v10  ;;  %814 = vrsqrt.f32 %v513_v9  ;;  %v720_v10 = vld [vmem:[%s1113_s6 + $0x1] sm:$0x1] }
 0x245   :  { %816 = vrsqrt.f32 %v514_v11 }
 0x250   :  { %v815_v12 = vpop.eup %814 }
 0x252   :  { %v817_v13 = vpop.eup %816 }
 0x253   :  { %v519_v14 = vcombine.low %v815_v12, %v817_v13 }
 0x255   :  { %v526_v15 = vrot.slane %v519_v14, %v1043_v25 }
 0x257   :  { %v533_v17 = vrot.slane %v526_v15, %v1043_v25 }
 0x259   :  { %v535_v18 = vmul.f32 %v533_v17, %v510_v16 }
 0x25b   :  { %v540_v19 = vrot.slane %v535_v18, %v1047_v31  ;;  %v544_v20 = vrot.slane %v535_v18, %v1049_v32 }
 0x25d   :  { %v547_v21 = vmul.f32 %v540_v19, %v500_v62  ;;  %v548_v22 = vmul.f32 %v544_v20, %v501_v3  ;;  %v568_v34 = vmul.f32 %v540_v19, %v1061_v26  ;;  %v571_v39 = vmul.f32 %v544_v20, %v465_v38 }
 0x25e   :  { %v569_v43 = vmul.f32 %v544_v20, %v1063_v27  ;;  %v570_v47 = vmul.f32 %v540_v19, %v1065_v28 }
 0x25f   :  { %v551_v23 = vcombine.low %v547_v21, %v548_v22 }
 0x261   :  { %v558_v24 = vrot.slane %v551_v23, %v1043_v25 }
 0x263   :  { %v565_v30 = vrot.slane %v558_v24, %v1043_v25 }
 0x265   :  { %v567_v33 = vsub.f32 %v759_v29, %v565_v30 }
 0x267   :  { %v576_v40 = vrot.slane %v567_v33, %v1047_v31  ;;  %v580_v41 = vrot.slane %v567_v33, %v1049_v32 }
 0x269   :  { %v583_v44 = vadd.f32 %v576_v40, %v568_v34  ;;  %v586_v45 = vadd.f32 %v580_v41, %v571_v39  ;;  %v584_v46 = vadd.f32 %v580_v41, %v569_v43  ;;  %v585_v50 = vadd.f32 %v576_v40, %v570_v47 }
 0x26b   :  { %v588_v48 = vmax.f32 %v584_v46, 0.0  ;;  %v587_v49 = vmax.f32 %v583_v44, 0.0  ;;  %v590_v25 = vmax.f32 %v586_v45, 0.0  ;;  %v589_v26 = vmax.f32 %v585_v50, 0.0 }
 0x26d   :  { %687 = vmatprep.mubr.f32.mxu0 %v588_v48 }
 0x26e   :  { %688 = vmatmul.mubr.f32.vlgmr.msra.gmra.mxu0 %v587_v49 }
 0x26f   :  { %692 = vmatprep.mubr.f32.mxu0 %v590_v25 }
 0x272   :  { %693 = vmatmul.mubr.f32.gmra.mxu0 %v589_v26 }
 0x32e   :  { %v792_v38 = vpop.f32.mrf.mxu0 }
 0x330   :  { %v793_v51 = vpop.f32.mrf.mxu0 }
 0x331   :  { %v794_v32 = vadd.f32 %v793_v51, %v792_v38 }
 0x332   :  { %v795_v52 = vpop.f32.mrf.mxu0 }
 0x333   :  { %v705_v54 = vmul.f32 %v794_v32, %v794_v32 }
 0x334   :  { %v796_v53 = vpop.f32.mrf.mxu0 }
 0x335   :  { %v797_v27 = vadd.f32 %v796_v53, %v795_v52 }
 0x337   :  { %v698_v55 = vadd.f32 %v797_v27, %v794_v32  ;;  %v706_v56 = vmul.f32 %v797_v27, %v797_v27 }
 0x339   :  { %v699_v57 = vrot.slane %v698_v55, 4  ;;  %v707_v28 = vadd.f32 %v706_v56, %v705_v54 }
 0x33b   :  { %v700_v58 = vadd.f32 %v699_v57, %v698_v55  ;;  %v708_v59 = vrot.slane %v707_v28, 4 }
 0x33d   :  { %v701_v42 = vrot.slane %v700_v58, 2  ;;  %v709_v36 = vadd.f32 %v708_v59, %v707_v28 }
 0x33f   :  { %v702_v60 = vadd.f32 %v701_v42, %v700_v58  ;;  %v710_v35 = vrot.slane %v709_v36, 2 }
 0x341   :  { %v703_v61 = vrot.slane %v702_v60, 1  ;;  %v711_v62 = vadd.f32 %v710_v35, %v709_v36 }
 0x343   :  { %v704_v37 = vadd.f32 %v703_v61, %v702_v60  ;;  %v712_v63 = vrot.slane %v711_v62, 1 }
 0x345   :  { %v713_v0 = vadd.f32 %v712_v63, %v711_v62  ;;  %v714_v1 = vmul.f32 0.0625, %v704_v37 }
 0x347   :  { %v715_v2 = vmul.f32 0.0625, %v713_v0  ;;  %v716_v3 = vmul.f32 %v714_v1, %v714_v1 }
 0x349   :  { %v717_v4 = vsub.f32 %v715_v2, %v716_v3 }
 0x34b   :  { %v718_v5 = vmax.f32 %v717_v4, 0.0 }
 0x34d   :  { %v721_v6 = vadd.f32 1e-05, %v718_v5 }
 0x34f   :  { %818 = vrsqrt.f32 %v721_v6 }
 0x35c   :  { %v819_v8 = vpop.eup %818 }
 0x35d   :  { %v723_v9 = vmul.f32 %v819_v8, %v719_v7 }
 0x35f   :  { %v724_v11 = vmul.f32 %v723_v9, %v714_v1  ;;  %v729_v12 = vrot.slane %v723_v9, %v1047_v31 }
 0x361   :  { %v725_v13 = vsub.f32 %v720_v10, %v724_v11  ;;  %v731_v14 = vmul.f32 %v797_v27, %v729_v12  ;;  %v730_v15 = vmul.f32 %v794_v32, %v729_v12 }
 0x363   :  { %v735_v16 = vrot.slane %v725_v13, %v1047_v31 }
 0x365   :  { %v736_v17 = vadd.f32 %v735_v16, %v730_v15  ;;  %v737_v18 = vadd.f32 %v735_v16, %v731_v14 }
 0x367   :  { %738 = vst [vmem:[#allocation11] sm:$0xff] %v736_v17  ;;  %739 = vst [vmem:[#allocation11 + $0x8] sm:$0xff] %v737_v18 }
 0x368   :  { %931 = shalt.err (!%p928_p1)
}
 0x369   :  { %751 = dma.vmem_to_hbm [thread:$0]  %s746_s10, 256, %s1114_s7, [#allocation4], %s953_s1, %s953_s1, %s954_s16  }
 0x36a   :  { %946 = dma.done.wait [#allocation4], 256  }
 0x36b   :  { %947 = vsyncadd [#allocation4], 4294967040 }
 0x36c   :  { %755 = vsyncpa [#allocation3], 1 }
 0x36d   :  { %756 = vsyncpa [#allocation6], 1 }
 0x36e   :  { %757 = vsyncpa [#allocation9], 1 }
 0x36f   :  { %758 = vsyncpa [#allocation4], 1 }

</bundles_post_ra>
